<compile_context>
chip_gen: v5e
topology: v5e:2x2
jax: 0.10.0
libtpu: 0.0.40
codegen_flags: <defaults>
</compile_context>

<pallas_src>
import jax
import jax.numpy as jnp
from jax.experimental import pallas as pl
from jax.experimental.pallas import tpu as pltpu


_LANE = 128
_MiB = 1024 * 1024


def _swish_kernel(x_ref, o_ref):
    # swish(x) = x * sigmoid(x), computed in f32.
    # sigmoid via tanh: one EUP transcendental, no VPU divide.
    x = x_ref[...].astype(jnp.float32)
    sig = 0.5 * (jnp.tanh(0.5 * x) + 1.0)
    o_ref[...] = (x * sig).astype(o_ref.dtype)


def _pick_lane_width(n: int) -> int:
    """Widest lane-dense last dim (multiple of 128) that divides n."""
    for w in (4096, 2048, 1024, 512, 256, 128):
        if n % w == 0:
            return w
    return _LANE  # unreachable when n % 128 == 0


def swish_pallas(x: jax.Array) -> jax.Array:
    """Elementwise swish on an arbitrary-shaped array via a Pallas TPU kernel."""
    orig_shape = x.shape
    dtype = x.dtype
    n = x.size
    if n == 0:
        return x

    itemsize = jnp.dtype(dtype).itemsize
    # Minimal sublane packing granularity: f32 -> 8, bf16/f16 -> 16, int8 -> 32.
    align = 8 * max(1, 4 // itemsize)

    # ---- zero-copy 2D slab (reshape of a contiguous array is free) ----------
    if n % _LANE == 0:
        w = _pick_lane_width(n)
        slab = x.reshape(n // w, w)
    elif x.ndim >= 2:
        # Ragged total size: keep the original last dim as the lane axis; the
        # BlockSpec uses the full last dim (or 128-multiple column tiles), so
        # no padding copy is ever made.
        slab = x.reshape(-1, orig_shape[-1])
    else:
        slab = x.reshape(1, n)
    rows, cols = slab.shape
    total_bytes = n * itemsize

    # ---- per-generation block budget ----------------------------------------
    try:
        vmem_bytes = int(pltpu.get_tpu_info().vmem_capacity_bytes)
    except Exception:  # pragma: no cover - conservative fallback
        vmem_bytes = 64 * _MiB
    # 8 MiB blocks on v7x (64 MiB/TC), 16 MiB on v5e/v6e (128 MiB VMEM).
    block_budget = min(16 * _MiB, vmem_bytes // 8)

    # ---- column tiling -------------------------------------------------------
    if cols * itemsize * align <= block_budget:
        tc = cols                                   # full last dim (exempt)
    else:
        # Pathologically wide ragged rows: tile columns in 128-lane multiples;
        # the cdiv grid masks the ragged last column block.
        tc = (block_budget // (align * itemsize)) // _LANE * _LANE
        tc = max(_LANE, tc)
    grid_c = pl.cdiv(cols, tc)

    # ---- row tiling ----------------------------------------------------------
    row_block_bytes = tc * itemsize
    tile_rows = (block_budget // row_block_bytes) // align * align
    tile_rows = max(align, tile_rows)

    # Guarantee pipeline depth + megacore work: >= 2 blocks above 2 MiB,
    # growing to >= 8 grid steps (>= 4 per v7x TensorCore) for large slabs.
    if total_bytes > 2 * _MiB:
        desired_steps = min(8, max(2, total_bytes // (2 * _MiB)))
        desired_r = pl.cdiv(desired_steps, grid_c)
        cap = pl.cdiv(pl.cdiv(rows, desired_r), align) * align
        tile_rows = min(tile_rows, cap)

    if tile_rows >= rows:
        # Block row dim == full array dim -> exempt from sublane alignment.
        tile_rows = rows
    grid_r = pl.cdiv(rows, tile_rows)

    # Raise the scoped-VMEM limit (v5e default is only 16 MiB of 128 MiB
    # physical); must cover ~4x block (double-buffered in+out) + headroom.
    vmem_limit = min(vmem_bytes * 3 // 4, 96 * _MiB)

    out = pl.pallas_call(
        _swish_kernel,
        out_shape=jax.ShapeDtypeStruct((rows, cols), dtype),
        grid=(grid_r, grid_c),
        in_specs=[pl.BlockSpec((tile_rows, tc), lambda i, j: (i, j))],
        out_specs=pl.BlockSpec((tile_rows, tc), lambda i, j: (i, j)),
        compiler_params=pltpu.CompilerParams(
            dimension_semantics=("parallel", "parallel"),
            vmem_limit_bytes=int(vmem_limit),
        ),
        cost_estimate=pl.CostEstimate(
            flops=5 * n,
            transcendentals=n,
            bytes_accessed=2 * n * itemsize,
        ),
    )(slab)

    return out.reshape(orig_shape)


if __name__ == "__main__":
    key = jax.random.PRNGKey(0)

    # NCHW, matching PyTorch conv conventions: batch=2, channels=4, spatial=16.
    x = jax.random.normal(key, (2, 4, 16, 16), dtype=jnp.float32)
    y = swish_pallas(x)
    jax.block_until_ready(y)
    y_ref = x * jax.nn.sigmoid(x)
    assert y.shape == x.shape and y.dtype == x.dtype
    assert jnp.allclose(y, y_ref, atol=1e-5, rtol=1e-5)

    # Odd-sized shape exercises the zero-copy ragged path (no pad, no slice).
    x2 = jax.random.normal(jax.random.PRNGKey(1), (3, 5, 7, 11), dtype=jnp.float32)
    y2 = swish_pallas(x2)
    jax.block_until_ready(y2)
    y2_ref = x2 * jax.nn.sigmoid(x2)
    assert y2.shape == x2.shape and y2.dtype == x2.dtype
    assert jnp.allclose(y2, y2_ref, atol=1e-5, rtol=1e-5)

    print("KERNEL_OK")
</pallas_src>

<mosaic_0001>
module attributes {stable_mosaic.version = 11 : i64} {
  func.func @_swish_kernel(%arg0: i32, %arg1: i32, %arg2: memref<1x2048xf32, #tpu.memory_space<vmem>>, %arg3: memref<1x2048xf32, #tpu.memory_space<vmem>>) attributes {dimension_semantics = [#tpu.dimension_semantics<parallel>, #tpu.dimension_semantics<parallel>], iteration_bounds = array<i64: 1, 1>, scalar_prefetch = 0 : i64, scratch_operands = 0 : i64, tpu.core_type = #tpu.core_type<tc>, window_params = [{transform_indices = @transform_0, window_bounds = array<i64: 1, 2048>}, {transform_indices = @transform_1, window_bounds = array<i64: 1, 2048>}]} {
    %c0 = arith.constant 0 : index
    %c0_0 = arith.constant 0 : index
    %0 = vector.load %arg2[%c0, %c0_0] : memref<1x2048xf32, #tpu.memory_space<vmem>>, vector<1x2048xf32>
    %cst = arith.constant 5.000000e-01 : f32
    %1 = vector.broadcast %cst : f32 to vector<1x2048xf32>
    %2 = arith.mulf %1, %0 : vector<1x2048xf32>
    %3 = math.tanh %2 : vector<1x2048xf32>
    %cst_1 = arith.constant 1.000000e+00 : f32
    %4 = vector.broadcast %cst_1 : f32 to vector<1x2048xf32>
    %5 = arith.addf %3, %4 : vector<1x2048xf32>
    %cst_2 = arith.constant 5.000000e-01 : f32
    %6 = vector.broadcast %cst_2 : f32 to vector<1x2048xf32>
    %7 = arith.mulf %6, %5 : vector<1x2048xf32>
    %8 = arith.mulf %0, %7 : vector<1x2048xf32>
    %c0_3 = arith.constant 0 : index
    %c0_4 = arith.constant 0 : index
    %9 = vector.load %arg3[%c0_3, %c0_4] : memref<1x2048xf32, #tpu.memory_space<vmem>>, vector<1x2048xf32>
    tpu.vector_store %arg3[%c0_3, %c0_4], %8 {strides = array<i32>} : memref<1x2048xf32, #tpu.memory_space<vmem>>, vector<1x2048xf32>,
    return
  }
  func.func @transform_0(%arg0: i32, %arg1: i32) -> (i32, i32) {
    %c0_i32 = arith.constant 0 : i32
    return %arg0, %arg1 : i32, i32
  }
  func.func @transform_1(%arg0: i32, %arg1: i32) -> (i32, i32) {
    %c0_i32 = arith.constant 0 : i32
    return %arg0, %arg1 : i32, i32
  }
}

</mosaic_0001>

<bundles_post_ra>
// kernel: tpu_custom_call.1
= control target key start
LH: loop header
LB: loop body
LE: loop exit
PB: predicated region body
PF: predicated region fallthrough
CT: control target
= control target key end

     0   :  { %6 = vsyncpa [#allocation3], 0  ;;  %s130_s0 = inlined_call_operand.hbm [shape: f32[1,2048], index: 0, kind: input, shape index: {}]   ;;  %s131_s1 = inlined_call_operand.hbm [shape: f32[1,2048], index: 1, kind: output, shape index: {}]  }
   0x1   :  { %7 = vsyncpa [#allocation4], 0  ;;  %s13_s8 = sshll.u32 %s130_s0, 4  ;;  %s112_s9 = smov [#allocation2]   ;;  %s14_s8 = int_to_ptr.hbm [resolvable:$true] %s13_s8 }
   0x2   :  { %s15_s10 = sshll.u32 %s112_s9, 4  ;;  %s16_s10 = int_to_ptr.vmem [resolvable:$true] %s15_s10 }
   0x3   :  { %18 = dma.hbm_to_vmem [thread:$0]  %s14_s8, 256, %s16_s10, [#allocation3]  }
   0x4   :  { %108 = dma.done.wait [#allocation3], 256  }
   0x5   :  { %109 = vsyncadd [#allocation3], 4294967040  ;;  %v23_v0 = vld [vmem:[#allocation2] sm:$0xff]  ;;  %v24_v1 = vld [vmem:[#allocation2 + $0x8] sm:$0xff]  ;;  %s113_s11 = smov [#allocation5]   ;;  %s44_s14 = sshll.u32 %s131_s1, 4  ;;  %s45_s14 = int_to_ptr.hbm [resolvable:$true] %s44_s14 }
   0x6   :  { %v25_v2 = vmul.f32 0.5, %v23_v0  ;;  %v26_v3 = vmul.f32 0.5, %v24_v1  ;;  %s42_s0 = sshll.u32 %s113_s11, 4  ;;  %s43_s0 = int_to_ptr.vmem [resolvable:$true] %s42_s0 }
   0x8   :  { %56 = vtanh.f32 %v25_v2 }
   0x9   :  { %58 = vtanh.f32 %v26_v3 }
   0xe   :  { %v57_v4 = vpop.eup %56 }
   0xf   :  { %v59_v5 = vpop.eup %58  ;;  %v29_v6 = vadd.f32 1.0, %v57_v4 }
  0x10   :  { %v30_v7 = vadd.f32 1.0, %v59_v5 }
  0x11   :  { %v31_v8 = vmul.f32 0.5, %v29_v6 }
  0x12   :  { %v32_v9 = vmul.f32 0.5, %v30_v7 }
  0x13   :  { %v33_v10 = vmul.f32 %v31_v8, %v23_v0 }
  0x14   :  { %v34_v11 = vmul.f32 %v32_v9, %v24_v1 }
  0x15   :  { %35 = vst [vmem:[#allocation5] sm:$0xff] %v33_v10 }
  0x16   :  { %36 = vst [vmem:[#allocation5 + $0x8] sm:$0xff] %v34_v11 }
  0x17   :  { %47 = dma.vmem_to_hbm [thread:$0]  %s43_s0, 256, %s45_s14, [#allocation4]  }
  0x18   :  { %110 = dma.done.wait [#allocation4], 256  }
  0x19   :  { %111 = vsyncadd [#allocation4], 4294967040 }
  0x1a   :  { %52 = vsyncpa [#allocation3], 1 }
  0x1b   :  { %53 = vsyncpa [#allocation4], 1 }

</bundles_post_ra>
